<compile_context>
chip_gen: v5e
topology: v5e:2x2
jax: 0.10.0
libtpu: 0.0.40
codegen_flags: <defaults>
</compile_context>

<pallas_src>
import functools
import math

import jax
import jax.numpy as jnp
from jax import lax
from jax.experimental import pallas as pl
from jax.experimental.pallas import tpu as pltpu


# --------------------------------------------------------------------------- #
# Kernel 1: full-row softmax, also materializes the p_attn block (module path) #
# --------------------------------------------------------------------------- #
def _sdpa_full_kernel(q_ref, k_ref, v_ref, o_ref, p_ref, *, scale):
    # Blocks (leading batch*head dim squeezed out by the BlockSpec):
    #   q_ref: (block_q, d_k)   k_ref: (L, d_k)   v_ref: (L, d_v)
    #   o_ref: (block_q, d_v)   p_ref: (block_q, L)
    q = q_ref[...]
    # Fold 1/sqrt(d_k) into the small (block_q, d_k) Q tile, not the (block_q, L) scores.
    q = q * jnp.asarray(scale, q.dtype)
    k = k_ref[...]
    v = v_ref[...]

    # scores = Q_scaled @ K^T -- contract on the last dims, no K transpose.
    s = lax.dot_general(
        q, k, (((1,), (1,)), ((), ())),
        preferred_element_type=jnp.float32)                      # (block_q, L) f32

    # Numerically stable softmax over keys, in f32. Exact divide: the
    # reciprocal only touches a (block_q, 1) column, approx saves nothing.
    m = jnp.max(s, axis=-1, keepdims=True)
    e = jnp.exp(s - m)
    denom = jnp.sum(e, axis=-1, keepdims=True)
    p = e / denom                                                # (block_q, L) f32

    # Cast once; reuse for both the P@V matmul and the p_attn store if possible.
    p_mm = p.astype(v.dtype)
    o = jnp.dot(p_mm, v, preferred_element_type=jnp.float32)

    o_ref[...] = o.astype(o_ref.dtype)
    if p_ref.dtype == p_mm.dtype:        # static (trace-time) dtype check
        p_ref[...] = p_mm
    else:
        p_ref[...] = p.astype(p_ref.dtype)


# --------------------------------------------------------------------------- #
# Kernel 2: online softmax over chunked K/V (no p_attn writeback)              #
# --------------------------------------------------------------------------- #
def _sdpa_flash_kernel(q_ref, k_ref, v_ref, o_ref, m_sc, l_sc, acc_sc, *, scale):
    # Blocks: q (block_q, d_k)  k (block_k, d_k)  v (block_k, d_v)  o (block_q, d_v)
    kv = pl.program_id(2)

    @pl.when(kv == 0)
    def _():
        m_sc[...] = jnp.full(m_sc.shape, -jnp.inf, dtype=m_sc.dtype)
        l_sc[...] = jnp.zeros(l_sc.shape, dtype=l_sc.dtype)
        acc_sc[...] = jnp.zeros(acc_sc.shape, dtype=acc_sc.dtype)

    q = q_ref[...]
    q = q * jnp.asarray(scale, q.dtype)
    k = k_ref[...]
    v = v_ref[...]

    s = lax.dot_general(
        q, k, (((1,), (1,)), ((), ())),
        preferred_element_type=jnp.float32)                      # (block_q, block_k)

    m_prev = m_sc[...]
    m_new = jnp.maximum(m_prev, jnp.max(s, axis=-1, keepdims=True))
    alpha = jnp.exp(m_prev - m_new)
    p = jnp.exp(s - m_new)

    l_sc[...] = alpha * l_sc[...] + jnp.sum(p, axis=-1, keepdims=True)
    acc_sc[...] = alpha * acc_sc[...] + jnp.dot(
        p.astype(v.dtype), v, preferred_element_type=jnp.float32)
    m_sc[...] = m_new

    @pl.when(kv == pl.num_programs(2) - 1)
    def _():
        o_ref[...] = (acc_sc[...] / l_sc[...]).astype(o_ref.dtype)


# --------------------------------------------------------------------------- #
# Wrapper                                                                      #
# --------------------------------------------------------------------------- #
def scaled_dot_product_attention(query, key, value, *, return_p_attn=True,
                                 block_q=None, block_k=None, p_attn_dtype=None):
    """Pallas forward of ScaledDotProductAttention.

    Returns (weighted value, p_attn).  With return_p_attn=False, p_attn is None
    and the kernel uses a flash-style online softmax with chunked K/V (no
    O(L^2) HBM writeback).  p_attn_dtype lets callers request e.g. bf16 to
    halve the O(L^2) writeback; default matches query.dtype (module semantics).
    """
    B, H, L, Dk = query.shape
    assert key.shape == (B, H, L, Dk), "key must match query on (B, H, L, d_k)"
    assert value.shape[:3] == (B, H, L), "value must match on (B, H, L)"
    Dv = value.shape[-1]

    BH = B * H
    q = query.reshape(BH, L, Dk)
    k = key.reshape(BH, L, Dk)
    v = value.reshape(BH, L, Dv)

    # block_q = 128 on every generation (v5e MXU is 128-wide; larger tiles only
    # add f32 score residency / VMEM pressure on v7x's 64 MiB).
    if block_q is None:
        block_q = 128 if L % 128 == 0 else L
    assert L % block_q == 0, "block_q must divide max_len"

    scale = 1.0 / math.sqrt(Dk)
    isz = jnp.dtype(query.dtype).itemsize
    osz = jnp.dtype(value.dtype).itemsize

    if return_p_attn:
        # ---- module-faithful path: full-row softmax + p_attn output --------
        p_dtype = jnp.dtype(p_attn_dtype) if p_attn_dtype is not None else jnp.dtype(query.dtype)
        psz = p_dtype.itemsize
        grid = (BH, L // block_q)

        q_spec = pl.BlockSpec((None, block_q, Dk), lambda b, i: (b, i, 0))
        k_spec = pl.BlockSpec((None, L, Dk), lambda b, i: (b, 0, 0))   # reused across i
        v_spec = pl.BlockSpec((None, L, Dv), lambda b, i: (b, 0, 0))   # reused across i
        o_spec = pl.BlockSpec((None, block_q, Dv), lambda b, i: (b, i, 0))
        p_spec = pl.BlockSpec((None, block_q, L), lambda b, i: (b, i, 0))

        # VMEM: double-buffered tiles + ~3 live (block_q, L) f32 intermediates.
        vmem_est = (2 * (block_q * Dk + L * Dk) * isz + 2 * L * Dv * osz
                    + 2 * (block_q * Dv * osz + block_q * L * psz)
                    + 3 * block_q * L * 4 + block_q * Dv * 4)
        # 40 MiB ceiling is safe across v5e/v6e/v7x; long-L callers should use
        # return_p_attn=False (flash path) instead of a bigger cap.
        vmem_limit = int(min(max(int(vmem_est * 1.25), 8 << 20), 40 << 20))

        out, p_attn = pl.pallas_call(
            functools.partial(_sdpa_full_kernel, scale=scale),
            grid=grid,
            in_specs=[q_spec, k_spec, v_spec],
            out_specs=[o_spec, p_spec],
            out_shape=(
                jax.ShapeDtypeStruct((BH, L, Dv), value.dtype),
                jax.ShapeDtypeStruct((BH, L, L), p_dtype),
            ),
            compiler_params=pltpu.CompilerParams(
                dimension_semantics=("parallel", "parallel"),
                vmem_limit_bytes=vmem_limit,
            ),
        )(q, k, v)
        return out.reshape(B, H, L, Dv), p_attn.reshape(B, H, L, L)

    # ---- fast path: online softmax, chunked K/V, no p_attn writeback -------
    if block_k is None:
        block_k = 128 if L % 128 == 0 else L
    assert L % block_k == 0, "block_k must divide max_len"
    grid = (BH, L // block_q, L // block_k)

    q_spec = pl.BlockSpec((None, block_q, Dk), lambda b, i, j: (b, i, 0))
    k_spec = pl.BlockSpec((None, block_k, Dk), lambda b, i, j: (b, j, 0))
    v_spec = pl.BlockSpec((None, block_k, Dv), lambda b, i, j: (b, j, 0))
    o_spec = pl.BlockSpec((None, block_q, Dv), lambda b, i, j: (b, i, 0))

    vmem_est = (2 * (block_q * Dk + block_k * Dk) * isz + 2 * block_k * Dv * osz
                + 2 * block_q * Dv * osz
                + (2 * block_q + block_q * Dv) * 4          # m/l/acc scratch
                + 3 * block_q * block_k * 4)                # live f32 temps
    vmem_limit = int(min(max(int(vmem_est * 1.5), 8 << 20), 40 << 20))

    out = pl.pallas_call(
        functools.partial(_sdpa_flash_kernel, scale=scale),
        grid=grid,
        in_specs=[q_spec, k_spec, v_spec],
        out_specs=o_spec,
        out_shape=jax.ShapeDtypeStruct((BH, L, Dv), value.dtype),
        scratch_shapes=[
            pltpu.VMEM((block_q, 1), jnp.float32),   # running max
            pltpu.VMEM((block_q, 1), jnp.float32),   # running denom
            pltpu.VMEM((block_q, Dv), jnp.float32),  # output accumulator
        ],
        compiler_params=pltpu.CompilerParams(
            dimension_semantics=("parallel", "parallel", "arbitrary"),
            vmem_limit_bytes=vmem_limit,
        ),
    )(q, k, v)
    return out.reshape(B, H, L, Dv), None


def sdpa_ref(query, key, value):
    # Pure-JAX reference mirroring the PyTorch forward exactly (mask/dropout = None).
    d_k = query.shape[-1]
    scores = jnp.einsum("bhqd,bhkd->bhqk", query, key,
                        precision=lax.Precision.HIGHEST) / jnp.sqrt(jnp.float32(d_k))
    p_attn = jax.nn.softmax(scores, axis=-1)
    out = jnp.einsum("bhqk,bhkd->bhqd", p_attn, value,
                     precision=lax.Precision.HIGHEST)
    return out, p_attn


if __name__ == "__main__":
    # Small shapes consistent with the module: (batch, heads, max_len, d).
    B, H, L, D = 2, 4, 128, 64
    rng = jax.random.PRNGKey(0)
    kq, kk, kv = jax.random.split(rng, 3)
    query = jax.random.normal(kq, (B, H, L, D), dtype=jnp.float32)
    keyt = jax.random.normal(kk, (B, H, L, D), dtype=jnp.float32)
    value = jax.random.normal(kv, (B, H, L, D), dtype=jnp.float32)

    # Module-faithful path: returns (weighted value, p_attn).
    out, p_attn = scaled_dot_product_attention(query, keyt, value)
    out = jax.block_until_ready(out)
    p_attn = jax.block_until_ready(p_attn)

    # Fast path: no p_attn writeback, chunked K/V online softmax.
    out_flash, _ = scaled_dot_product_attention(
        query, keyt, value, return_p_attn=False, block_k=64)
    out_flash = jax.block_until_ready(out_flash)

    ref_out, ref_p = sdpa_ref(query, keyt, value)
    assert out.shape == (B, H, L, D)
    assert p_attn.shape == (B, H, L, L)
    assert out_flash.shape == (B, H, L, D)
    assert jnp.allclose(out, ref_out, atol=1e-3, rtol=1e-3), "weighted value mismatch"
    assert jnp.allclose(p_attn, ref_p, atol=1e-3, rtol=1e-3), "p_attn mismatch"
    assert jnp.allclose(out_flash, ref_out, atol=1e-3, rtol=1e-3), "flash path mismatch"
    print("KERNEL_OK")
</pallas_src>

<mosaic_0001>
module attributes {stable_mosaic.version = 11 : i64} {
  func.func @_sdpa_full_kernel(%arg0: i32, %arg1: i32, %arg2: memref<1x128x64xf32, #tpu.memory_space<vmem>>, %arg3: memref<1x128x64xf32, #tpu.memory_space<vmem>>, %arg4: memref<1x128x64xf32, #tpu.memory_space<vmem>>, %arg5: memref<1x128x64xf32, #tpu.memory_space<vmem>>, %arg6: memref<1x128x128xf32, #tpu.memory_space<vmem>>) attributes {dimension_semantics = [#tpu.dimension_semantics<parallel>, #tpu.dimension_semantics<parallel>], iteration_bounds = array<i64: 8, 1>, scalar_prefetch = 0 : i64, scratch_operands = 0 : i64, tpu.core_type = #tpu.core_type<tc>, window_params = [{transform_indices = @transform_0, window_bounds = array<i64: 1, 128, 64>}, {transform_indices = @transform_1, window_bounds = array<i64: 1, 128, 64>}, {transform_indices = @transform_2, window_bounds = array<i64: 1, 128, 64>}, {transform_indices = @transform_3, window_bounds = array<i64: 1, 128, 64>}, {transform_indices = @transform_4, window_bounds = array<i64: 1, 128, 128>}]} {
    %c0 = arith.constant 0 : index
    %c0_0 = arith.constant 0 : index
    %c0_1 = arith.constant 0 : index
    %0 = vector.load %arg2[%c0, %c0_0, %c0_1] : memref<1x128x64xf32, #tpu.memory_space<vmem>>, vector<1x128x64xf32>
    %1 = vector.shape_cast %0 : vector<1x128x64xf32> to vector<128x64xf32>
    %cst = arith.constant 1.250000e-01 : f32
    %2 = vector.broadcast %cst : f32 to vector<128x64xf32>
    %3 = arith.mulf %1, %2 : vector<128x64xf32>
    %c0_2 = arith.constant 0 : index
    %c0_3 = arith.constant 0 : index
    %c0_4 = arith.constant 0 : index
    %4 = vector.load %arg3[%c0_2, %c0_3, %c0_4] : memref<1x128x64xf32, #tpu.memory_space<vmem>>, vector<1x128x64xf32>
    %5 = vector.shape_cast %4 : vector<1x128x64xf32> to vector<128x64xf32>
    %c0_5 = arith.constant 0 : index
    %c0_6 = arith.constant 0 : index
    %c0_7 = arith.constant 0 : index
    %6 = vector.load %arg4[%c0_5, %c0_6, %c0_7] : memref<1x128x64xf32, #tpu.memory_space<vmem>>, vector<1x128x64xf32>
    %7 = vector.shape_cast %6 : vector<1x128x64xf32> to vector<128x64xf32>
    %cst_8 = arith.constant dense<0.000000e+00> : vector<128x128xf32>
    %8 = tpu.matmul %3, %5, %cst_8 {dimension_numbers = #tpu.dot_dimension_numbers<[1], [1], [0], [0], [0, 0, 1, 0], [], []>} : vector<128x64xf32>, vector<128x64xf32>, vector<128x128xf32> -> vector<128x128xf32>
    %cst_9 = arith.constant dense<0xFF800000> : vector<128xf32>
    %9 = vector.multi_reduction <maximumf>, %8, %cst_9 [1] : vector<128x128xf32> to vector<128xf32>
    %10 = vector.shape_cast %9 : vector<128xf32> to vector<128x1xf32>
    %11 = vector.broadcast %10 : vector<128x1xf32> to vector<128x128xf32>
    %12 = arith.subf %8, %11 : vector<128x128xf32>
    %13 = math.exp %12 : vector<128x128xf32>
    %cst_10 = arith.constant dense<0.000000e+00> : vector<128xf32>
    %14 = vector.multi_reduction <add>, %13, %cst_10 [1] : vector<128x128xf32> to vector<128xf32>
    %15 = vector.shape_cast %14 : vector<128xf32> to vector<128x1xf32>
    %16 = vector.broadcast %15 : vector<128x1xf32> to vector<128x128xf32>
    %17 = arith.divf %13, %16 : vector<128x128xf32>
    %cst_11 = arith.constant dense<0.000000e+00> : vector<128x64xf32>
    %18 = tpu.matmul %17, %7, %cst_11 {dimension_numbers = #tpu.dot_dimension_numbers<[1], [0], [0], [1], [0, 0, 1, 1], [], []>} : vector<128x128xf32>, vector<128x64xf32>, vector<128x64xf32> -> vector<128x64xf32>
    %c0_12 = arith.constant 0 : index
    %c0_13 = arith.constant 0 : index
    %c0_14 = arith.constant 0 : index
    %19 = vector.load %arg5[%c0_12, %c0_13, %c0_14] : memref<1x128x64xf32, #tpu.memory_space<vmem>>, vector<1x128x64xf32>
    %20 = vector.shape_cast %19 : vector<1x128x64xf32> to vector<128x64xf32>
    %21 = vector.shape_cast %18 : vector<128x64xf32> to vector<1x128x64xf32>
    tpu.vector_store %arg5[%c0_12, %c0_13, %c0_14], %21 {strides = array<i32>} : memref<1x128x64xf32, #tpu.memory_space<vmem>>, vector<1x128x64xf32>,
    %c0_15 = arith.constant 0 : index
    %c0_16 = arith.constant 0 : index
    %c0_17 = arith.constant 0 : index
    %22 = vector.load %arg6[%c0_15, %c0_16, %c0_17] : memref<1x128x128xf32, #tpu.memory_space<vmem>>, vector<1x128x128xf32>
    %23 = vector.shape_cast %22 : vector<1x128x128xf32> to vector<128x128xf32>
    %24 = vector.shape_cast %17 : vector<128x128xf32> to vector<1x128x128xf32>
    tpu.vector_store %arg6[%c0_15, %c0_16, %c0_17], %24 {strides = array<i32>} : memref<1x128x128xf32, #tpu.memory_space<vmem>>, vector<1x128x128xf32>,
    return
  }
  func.func @transform_0(%arg0: i32, %arg1: i32) -> (i32, i32, i32) {
    %c0_i32 = arith.constant 0 : i32
    %c0_i32_0 = arith.constant 0 : i32
    return %arg0, %arg1, %c0_i32 : i32, i32, i32
  }
  func.func @transform_1(%arg0: i32, %arg1: i32) -> (i32, i32, i32) {
    %c0_i32 = arith.constant 0 : i32
    %c0_i32_0 = arith.constant 0 : i32
    %c0_i32_1 = arith.constant 0 : i32
    return %arg0, %c0_i32, %c0_i32_0 : i32, i32, i32
  }
  func.func @transform_2(%arg0: i32, %arg1: i32) -> (i32, i32, i32) {
    %c0_i32 = arith.constant 0 : i32
    %c0_i32_0 = arith.constant 0 : i32
    %c0_i32_1 = arith.constant 0 : i32
    return %arg0, %c0_i32, %c0_i32_0 : i32, i32, i32
  }
  func.func @transform_3(%arg0: i32, %arg1: i32) -> (i32, i32, i32) {
    %c0_i32 = arith.constant 0 : i32
    %c0_i32_0 = arith.constant 0 : i32
    return %arg0, %arg1, %c0_i32 : i32, i32, i32
  }
  func.func @transform_4(%arg0: i32, %arg1: i32) -> (i32, i32, i32) {
    %c0_i32 = arith.constant 0 : i32
    %c0_i32_0 = arith.constant 0 : i32
    return %arg0, %arg1, %c0_i32 : i32, i32, i32
  }
}

</mosaic_0001>

<bundles_post_ra>
// kernel: tpu_custom_call.1
= control target key start
LH: loop header
LB: loop body
LE: loop exit
PB: predicated region body
PF: predicated region fallthrough
CT: control target
= control target key end

     0   :  { %10 = vsyncpa [#allocation3], 0  ;;  %s2011_s0 = inlined_call_operand.vmem [shape: f32[8,128,64], index: 0, kind: input, shape index: {}]   ;;  %s2012_s1 = inlined_call_operand.vmem [shape: f32[8,128,64], index: 1, kind: input, shape index: {}]   ;;  %s2013_s2 = inlined_call_operand.vmem [shape: f32[8,128,64], index: 2, kind: input, shape index: {}]   ;;  %s2014_s3 = inlined_call_operand.vmem [shape: f32[8,128,64], index: 3, kind: output, shape index: {0}]   ;;  %s2015_s4 = inlined_call_operand.hbm [shape: f32[8,128,128], index: 4, kind: output, shape index: {1}]  }
   0x1   :  { %12 = vsyncpa [#allocation3 + $0x1], 0  ;;  %s1485_s15 = smov 0   ;;  %s1487_s16 = smov 0  }
   0x2   :  { %s1489_s17 = smov 0   ;;  %s1491_s18 = smov 0  }
   0x3   :  { %s1493_s19 = smov 0   ;;  %s1495_s20 = smov 0  }
   0x4 LB: > { %s1137_s21 = sadd.s32 4294967295, %s1456_s20   ;;  %s1138_s22 = sadd.s32 4294967294, %s1456_s20   ;;  %s1456_s20 = sphi %s1495_s20, %s18_s20   ;;  %s1452_s19 = sphi %s1493_s19, %s2034_s19   ;;  %s1448_s18 = sphi %s1491_s18, %s2033_s18   ;;  %s1444_s17 = sphi %s1489_s17, %s2032_s17   ;;  %s1440_s16 = sphi %s1487_s16, %s2031_s16   ;;  %s1436_s15 = sphi %s1485_s15, %s2030_s15  }
   0x5   : > { %s30_s23 = sadd.s32 1, %s1452_s19  ;;  %s147_s24 = sadd.s32 1, %s1444_s17 }
   0x6   : > { %p32_p0 = scmp.ge.s32.totalorder %s30_s23, 8  ;;  %p157_p1 = scmp.ne.s32.totalorder %s1444_s17, %s1440_s16 }
   0x7   : > { %p158_p2 = scmp.eq.s32.totalorder %s1137_s21, 7  ;;  %p163_p3 = scmp.ne.s32.totalorder %s1440_s16, %s1436_s15 }
   0x8   : > { %s2036_s23 = smov (%p32_p0, %s30_s23), 0  ;;  %p164_p5 = scmp.eq.s32.totalorder %s1138_s22, 7 }
   0x9   : > { %p1525_p4 = por %p158_p2, %p157_p1  ;;  %s142_s26 = ssub.s32 %s1452_s19, %s2036_s23 }
   0xa   : > { %p1141_p6 = scmp.ge.s32.totalorder %s1456_s20, 1  ;;  %p145_p7 = scmp.eq.s32.totalorder %s142_s26, 0 }
   0xb   : > { %p1532_p8 = por %p164_p5, %p163_p3  ;;  %p211_p9 = scmp.lt.s32.totalorder %s1456_s20, 9 }
   0xc   : > { %s1538_s28 = scalar_select %p145_p7, %s1444_s17, %s147_s24  }
   0xd   : > { %p212_p10 = pnand %p1141_p6, %p211_p9 }
   0xe   : > { %p261_p11 = scmp.lt.s32.totalorder (!%p212_p10), %s1448_s18, 7  ;;  %s257_s14 = sand.u32 (!%p212_p10), 1, %s1440_s16  }
   0xf   : > { %215 = sbr.rel (%p212_p10) target bundleno = 778 (0x30a), region = 32  ;;  %s1142_s21 = sshll.u32 (!%p212_p10), %s257_s14, 7 }
  0x10   : > { %s1761_s22 = scalar_lea.vmem (!%p212_p10), [#allocation2], %s1142_s21  ;;  %s1398_s21 = scalar_lea.hbm (!%p212_p10), %s2015_s4, 1024 }
  0x11   : > { %s994_s5 = sshll.u32 (!%p212_p10), %s1761_s22, 4  ;;  %s995_s5 = int_to_ptr.vmem [resolvable:$true] %s994_s5 }
  0x14   : > { %s262_s29 = scalar_select %p261_p11, %s1448_s18, 7  ;;  %vm355_vm0 = vcmask 523264  }
  0x16   : > { %s1542_s30 = sshll.u32 %s262_s29, 7 }
  0x17   : > { %s1548_s7 = scalar_lea.vmem %s2012_s1, %s1542_s30  ;;  %s1610_s10 = scalar_lea.vmem %s2011_s0, %s1542_s30 }
  0x18   : > { %v338_v0 = vld [vmem:[%s1548_s7 + $0x78] sm:$0xff]  ;;  %v337_v1 = vld [vmem:[%s1548_s7 + $0x70] sm:$0xff]  ;;  %v336_v2 = vld [vmem:[%s1548_s7 + $0x68] sm:$0xff]  ;;  %s1697_s13 = scalar_lea.vmem %s2013_s2, %s1542_s30  ;;  %s1934_s29 = scalar_lea.vmem %s2014_s3, %s1542_s30 }
  0x19   : > { %1151 = vmatpush.xpose.msk.msra.mxu0 %vm355_vm0, %v338_v0  ;;  %1193 = vmatpush.xpose.msk.msra.mxu2 %vm355_vm0, %v338_v0  ;;  %v335_v3 = vld [vmem:[%s1548_s7 + $0x60] sm:$0xff]  ;;  %v334_v4 = vld [vmem:[%s1548_s7 + $0x58] sm:$0xff]  ;;  %v333_v5 = vld [vmem:[%s1548_s7 + $0x50] sm:$0xff]  ;;  %s1192_s30 = sshll.u32 %s1448_s18, 7 }
  0x1a   : > { %1194 = vmatpush.xpose.msk.msra.mxu3 %vm355_vm0, %v338_v0  ;;  %v332_v6 = vld [vmem:[%s1548_s7 + $0x48] sm:$0xff]  ;;  %v331_v7 = vld [vmem:[%s1548_s7 + $0x40] sm:$0xff]  ;;  %v330_v8 = vld [vmem:[%s1548_s7 + $0x38] sm:$0xff]  ;;  %s993_s8 = scalar_lea.hbm %s2015_s4, %s1192_s30 }
  0x1b   : > { %v329_v9 = vld [vmem:[%s1548_s7 + $0x30] sm:$0xff]  ;;  %v328_v10 = vld [vmem:[%s1548_s7 + $0x28] sm:$0xff]  ;;  %v327_v11 = vld [vmem:[%s1548_s7 + $0x20] sm:$0xff]  ;;  %s996_s9 = sshll.u32 %s993_s8, 4  ;;  %s997_s9 = int_to_ptr.hbm [resolvable:$true] %s996_s9 }
  0x1c   : > { %v326_v12 = vld [vmem:[%s1548_s7 + $0x18] sm:$0xff]  ;;  %v325_v13 = vld [vmem:[%s1548_s7 + $0x10] sm:$0xff]  ;;  %v324_v14 = vld [vmem:[%s1548_s7 + $0x8] sm:$0xff]  ;;  %s1392_s11 = sshra.s32 %s997_s9, 4  ;;  %s1393_s11 = int_to_ptr.hbm [resolvable:$true] %s1392_s11 }
  0x1d   : > { %1152 = vmatpush.xpose.msk.msra.mxu0 %vm355_vm0, %v337_v1  ;;  %1195 = vmatpush.xpose.msk.msra.mxu2 %vm355_vm0, %v337_v1  ;;  %v291_v15 = vld [vmem:[%s1610_s10] sm:$0xff]  ;;  %v296_v16 = vld [vmem:[%s1610_s10 + $0x28] sm:$0xff]  ;;  %v297_v23 = vld [vmem:[%s1610_s10 + $0x30] sm:$0xff]  ;;  %s1394_s12 = scalar_lea.hbm %s1393_s11, 128  ;;  %p1399_p1 = scmp.lt.s32.totalorder %s1393_s11, %s2015_s4 }
  0x1e   : > { %1196 = vmatpush.xpose.msk.msra.mxu3 %vm355_vm0, %v337_v1  ;;  %v323_v17 = vld [vmem:[%s1548_s7] sm:$0xff]  ;;  %v307_v19 = vmul.f32 0.125, %v291_v15  ;;  %v312_v20 = vmul.f32 0.125, %v296_v16  ;;  %v292_v22 = vld [vmem:[%s1610_s10 + $0x8] sm:$0xff]  ;;  %v313_v26 = vmul.f32 0.125, %v297_v23  ;;  %v293_v28 = vld [vmem:[%s1610_s10 + $0x10] sm:$0xff]  ;;  %p1395_p12 = scmp.ne.s32.totalorder %s1393_s11, %s1394_s12  ;;  %p1400_p2 = scmp.lt.s32.totalorder %s1398_s21, %s1394_s12 }
  0x1f   : > { %v303_v18 = vld [vmem:[%s1610_s10 + $0x60] sm:$0xff]  ;;  %v304_v24 = vld [vmem:[%s1610_s10 + $0x68] sm:$0xff]  ;;  %v308_v25 = vmul.f32 0.125, %v292_v22  ;;  %v298_v29 = vld [vmem:[%s1610_s10 + $0x38] sm:$0xff]  ;;  %v309_v31 = vmul.f32 0.125, %v293_v28 }
  0x20   : > { %v319_v21 = vmul.f32 0.125, %v303_v18  ;;  %v320_v27 = vmul.f32 0.125, %v304_v24  ;;  %v305_v30 = vld [vmem:[%s1610_s10 + $0x70] sm:$0xff]  ;;  %v314_v32 = vmul.f32 0.125, %v298_v29  ;;  %v294_v34 = vld [vmem:[%s1610_s10 + $0x18] sm:$0xff]  ;;  %v299_v35 = vld [vmem:[%s1610_s10 + $0x40] sm:$0xff]  ;;  %p1396_p13 = pnand %p1395_p12, %p1525_p4  ;;  %p1401_p3 = por %p1400_p2, %p1399_p1 }
  0x21   : > { %1153 = vmatpush.xpose.msk.msra.mxu0 %vm355_vm0, %v336_v2  ;;  %1197 = vmatpush.xpose.msk.msra.mxu2 %vm355_vm0, %v336_v2  ;;  %v321_v33 = vmul.f32 0.125, %v305_v30  ;;  %v310_v36 = vmul.f32 0.125, %v294_v34  ;;  %v315_v37 = vmul.f32 0.125, %v299_v35  ;;  %v295_v38 = vld [vmem:[%s1610_s10 + $0x20] sm:$0xff]  ;;  %v300_v39 = vld [vmem:[%s1610_s10 + $0x48] sm:$0xff]  ;;  %v301_v42 = vld [vmem:[%s1610_s10 + $0x50] sm:$0xff] }
  0x22   : > { %1198 = vmatpush.xpose.msk.msra.mxu3 %vm355_vm0, %v336_v2  ;;  %v311_v40 = vmul.f32 0.125, %v295_v38  ;;  %v316_v41 = vmul.f32 0.125, %v300_v39  ;;  %v317_v43 = vmul.f32 0.125, %v301_v42  ;;  %v302_v44 = vld [vmem:[%s1610_s10 + $0x58] sm:$0xff]  ;;  %p1397_p0 = pneg %p1396_p13 }
  0x23   : > { %v318_v45 = vmul.f32 0.125, %v302_v44  ;;  %v306_v47 = vld [vmem:[%s1610_s10 + $0x78] sm:$0xff]  ;;  %s976_s10 = scalar_lea.sflag [#allocation3], %s257_s14 }
  0x24   : > { %v322_v48 = vmul.f32 0.125, %v306_v47  ;;  %p1402_p5 = pnand %p1401_p3, %p1397_p0 }
  0x25   : > { %1154 = vmatpush.xpose.msk.msra.mxu0 %vm355_vm0, %v335_v3  ;;  %1199 = vmatpush.xpose.msk.msra.mxu2 %vm355_vm0, %v335_v3 }
  0x26   : > { %1200 = vmatpush.xpose.msk.msra.mxu3 %vm355_vm0, %v335_v3 }
  0x29   : > { %1155 = vmatpush.xpose.msk.msra.mxu0 %vm355_vm0, %v334_v4  ;;  %1201 = vmatpush.xpose.msk.msra.mxu2 %vm355_vm0, %v334_v4 }
  0x2a   : > { %1202 = vmatpush.xpose.msk.msra.mxu3 %vm355_vm0, %v334_v4 }
  0x2d   : > { %1156 = vmatpush.xpose.msk.msra.mxu0 %vm355_vm0, %v333_v5  ;;  %1203 = vmatpush.xpose.msk.msra.mxu2 %vm355_vm0, %v333_v5 }
  0x2e   : > { %1204 = vmatpush.xpose.msk.msra.mxu3 %vm355_vm0, %v333_v5 }
  0x31   : > { %1157 = vmatpush.xpose.msk.msra.mxu0 %vm355_vm0, %v332_v6  ;;  %1205 = vmatpush.xpose.msk.msra.mxu2 %vm355_vm0, %v332_v6 }
  0x32   : > { %1206 = vmatpush.xpose.msk.msra.mxu3 %vm355_vm0, %v332_v6 }
  0x35   : > { %1158 = vmatpush.xpose.msk.msra.mxu0 %vm355_vm0, %v331_v7  ;;  %1207 = vmatpush.xpose.msk.msra.mxu2 %vm355_vm0, %v331_v7 }
  0x36   : > { %1208 = vmatpush.xpose.msk.msra.mxu3 %vm355_vm0, %v331_v7 }
  0x39   : > { %1159 = vmatpush.xpose.msk.msra.mxu0 %vm355_vm0, %v330_v8  ;;  %1209 = vmatpush.xpose.msk.msra.mxu2 %vm355_vm0, %v330_v8 }
  0x3a   : > { %1210 = vmatpush.xpose.msk.msra.mxu3 %vm355_vm0, %v330_v8 }
  0x3d   : > { %1160 = vmatpush.xpose.msk.msra.mxu0 %vm355_vm0, %v329_v9  ;;  %1211 = vmatpush.xpose.msk.msra.mxu2 %vm355_vm0, %v329_v9 }
  0x3e   : > { %1212 = vmatpush.xpose.msk.msra.mxu3 %vm355_vm0, %v329_v9 }
  0x41   : > { %1161 = vmatpush.xpose.msk.msra.mxu0 %vm355_vm0, %v328_v10  ;;  %1213 = vmatpush.xpose.msk.msra.mxu2 %vm355_vm0, %v328_v10 }
  0x42   : > { %1214 = vmatpush.xpose.msk.msra.mxu3 %vm355_vm0, %v328_v10 }
  0x45   : > { %1162 = vmatpush.xpose.msk.msra.mxu0 %vm355_vm0, %v327_v11  ;;  %1215 = vmatpush.xpose.msk.msra.mxu2 %vm355_vm0, %v327_v11 }
  0x46   : > { %1216 = vmatpush.xpose.msk.msra.mxu3 %vm355_vm0, %v327_v11 }
  0x49   : > { %1163 = vmatpush.xpose.msk.msra.mxu0 %vm355_vm0, %v326_v12  ;;  %1217 = vmatpush.xpose.msk.msra.mxu2 %vm355_vm0, %v326_v12 }
  0x4a   : > { %1218 = vmatpush.xpose.msk.msra.mxu3 %vm355_vm0, %v326_v12 }
  0x4d   : > { %1164 = vmatpush.xpose.msk.msra.mxu0 %vm355_vm0, %v325_v13  ;;  %1219 = vmatpush.xpose.msk.msra.mxu2 %vm355_vm0, %v325_v13 }
  0x4e   : > { %1220 = vmatpush.xpose.msk.msra.mxu3 %vm355_vm0, %v325_v13 }
  0x51   : > { %1165 = vmatpush.xpose.msk.msra.mxu0 %vm355_vm0, %v324_v14  ;;  %1221 = vmatpush.xpose.msk.msra.mxu2 %vm355_vm0, %v324_v14 }
  0x52   : > { %1222 = vmatpush.xpose.msk.msra.mxu3 %vm355_vm0, %v324_v14 }
  0x55   : > { %1166 = vmatpush.xpose.msk.msra.mxu0 %vm355_vm0, %v323_v17  ;;  %1223 = vmatpush.xpose.msk.msra.mxu2 %vm355_vm0, %v323_v17 }
  0x56   : > { %1224 = vmatpush.xpose.msk.msra.mxu3 %vm355_vm0, %v323_v17 }
  0x58   : > { %1167 = vmatmul.msk.f32.vlgmr.msra.gmra.mxu0 %vm355_vm0, %v307_v19  ;;  %1172 = vmatmul.msk.f32.vlgmr.msra.gmra.mxu2 %vm355_vm0, %v312_v20 }
  0x59   : > { %1179 = vmatmul.msk.f32.vlgmr.msra.gmra.mxu3 %vm355_vm0, %v319_v21 }
  0x60   : > { %1168 = vmatmul.msk.f32.gmra.mxu0 %vm355_vm0, %v308_v25  ;;  %1173 = vmatmul.msk.f32.gmra.mxu2 %vm355_vm0, %v313_v26 }
  0x61   : > { %1180 = vmatmul.msk.f32.gmra.mxu3 %vm355_vm0, %v320_v27 }
  0x68   : > { %1169 = vmatmul.msk.f32.gmra.mxu0 %vm355_vm0, %v309_v31  ;;  %1174 = vmatmul.msk.f32.gmra.mxu2 %vm355_vm0, %v314_v32  ;;  %v354_v32 = vld [vmem:[%s1697_s13 + $0x78] sm:$0xff] }
  0x69   : > { %1181 = vmatmul.msk.f32.gmra.mxu3 %vm355_vm0, %v321_v33  ;;  %v353_v33 = vld [vmem:[%s1697_s13 + $0x70] sm:$0xff]  ;;  %1225 = vmatpush.msra.mxu1 %v354_v32 }
  0x6a   : > { %1226 = vmatpush.msrb.mxu3 %v354_v32  ;;  %869 = vmatpush.msrb.mxu0 %v354_v32 }
  0x6b   : > { %1227 = vmatpush.msra.mxu1 %v353_v33 }
  0x6c   : > { %1228 = vmatpush.msrb.mxu3 %v353_v33  ;;  %870 = vmatpush.msrb.mxu0 %v353_v33 }
  0x70   : > { %1170 = vmatmul.msk.f32.gmra.mxu0 %vm355_vm0, %v310_v36  ;;  %1175 = vmatmul.msk.f32.gmra.mxu2 %vm355_vm0, %v315_v37  ;;  %v352_v37 = vld [vmem:[%s1697_s13 + $0x68] sm:$0xff] }
  0x71   : > { %1182 = vmatmul.msk.f32.gmra.mxu3 %vm355_vm0, %v322_v48  ;;  %1229 = vmatpush.msra.mxu1 %v352_v37 }
  0x72   : > { %1230 = vmatpush.msrb.mxu3 %v352_v37  ;;  %871 = vmatpush.msrb.mxu0 %v352_v37 }
  0x78   : > { %1171 = vmatmul.msk.f32.gmra.mxu0 %vm355_vm0, %v311_v40  ;;  %1176 = vmatmul.msk.f32.gmra.mxu2 %vm355_vm0, %v316_v41  ;;  %v351_v41 = vld [vmem:[%s1697_s13 + $0x60] sm:$0xff] }
  0x79   : > { %1231 = vmatpush.msra.mxu1 %v351_v41  ;;  %1232 = vmatpush.msrb.mxu3 %v351_v41 }
  0x7a   : > { %872 = vmatpush.msrb.mxu0 %v351_v41 }
  0x80   : > { %1177 = vmatmul.msk.f32.gmra.mxu2 %vm355_vm0, %v317_v43  ;;  %v350_v43 = vld [vmem:[%s1697_s13 + $0x58] sm:$0xff] }
  0x81   : > { %1233 = vmatpush.msra.mxu1 %v350_v43  ;;  %1234 = vmatpush.msrb.mxu3 %v350_v43 }
  0x82   : > { %873 = vmatpush.msrb.mxu0 %v350_v43 }
  0x88   : > { %1178 = vmatmul.msk.f32.gmra.mxu2 %vm355_vm0, %v318_v45 }
  0xd5   : > { %v1650_v46 = vpop.f32.mrf.mxu0 }
  0xdb   : > { %v484_v49 = vpop.f32.mrf.mxu2 }
  0xdc   : > { %v1659_v55 = vpop.f32.mrf.mxu3 }
  0xdd   : > { %v1654_v50 = vpop.f32.mrf.mxu0 }
  0xe3   : > { %v1656_v51 = vpop.f32.mrf.mxu2 }
  0xe4   : > { %529 = vmax.xlane.f32.xlu2 %v1656_v51  ;;  %v508_v58 = vpop.f32.mrf.mxu3 }
  0xe5   : > { %v475_v52 = vpop.f32.mrf.mxu0 }
  0xe6   : > { %521 = vmax.xlane.f32.xlu0 %v475_v52 }
  0xeb   : > { %v490_v53 = vpop.f32.mrf.mxu2 }
  0xec   : > { %531 = vmax.xlane.f32.xlu2 %v490_v53  ;;  %v1669_v61 = vpop.f32.mrf.mxu3 }
  0xed   : > { %v478_v54 = vpop.f32.mrf.mxu0 }
  0xee   : > { %523 = vmax.xlane.f32.xlu0 %v478_v54 }
  0xf3   : > { %v1661_v56 = vpop.f32.mrf.mxu2 }
  0xf4   : > { %v1691_v28 = vpop.f32.mrf.mxu3 }
  0xf5   : > { %v481_v57 = vpop.f32.mrf.mxu0 }
  0xf6   : > { %533 = vmax.xlane.f32.xlu0 %v1661_v56  ;;  %525 = vmax.xlane.f32.xlu1 %v481_v57 }
  0xfb   : > { %v1664_v59 = vpop.f32.mrf.mxu2 }
  0xfc   : > { %535 = vmax.xlane.f32.xlu2 %v1664_v59 }
  0xfe   : > { %543 = vmax.xlane.f32.xlu0 %v508_v58  ;;  %527 = vmax.xlane.f32.xlu1 %v484_v49 }
 0x103   : > { %v1667_v60 = vpop.f32.mrf.mxu2 }
 0x104   : > { %537 = vmax.xlane.f32.xlu2 %v1667_v60 }
 0x106   : > { %545 = vmax.xlane.f32.xlu0 %v1669_v61 }
 0x10b   : > { %v1673_v62 = vpop.f32.mrf.mxu2 }
 0x10c   : > { %517 = vmax.xlane.f32.xlu2 %v1650_v46 }
 0x10e   : > { %539 = vmax.xlane.f32.xlu0 %v1673_v62 }
 0x116   : > { %519 = vmax.xlane.f32.xlu0 %v1654_v50 }
 0x157   : > { %v530_v63 = vpop.xlane.xlu2 %529 }
 0x158   : > { %v555_v24 = vsub.f32 %v1656_v51, %v530_v63 }
 0x159   : > { %v522_v0 = vpop.xlane.xlu0 %521 }
 0x15a   : > { %v551_v1 = vsub.f32 %v475_v52, %v522_v0  ;;  %v577_v27 = vmul.f32 1.442695, %v555_v24  ;;  %v347_v0 = vld [vmem:[%s1697_s13 + $0x40] sm:$0xff] }
 0x15c   : > { %v569_v2 = vmul.f32 1.442695, %v551_v1  ;;  %v346_v1 = vld [vmem:[%s1697_s13 + $0x38] sm:$0xff] }
 0x15e   : > { %1314 = vpow2.f32 %v569_v2  ;;  %v345_v2 = vld [vmem:[%s1697_s13 + $0x30] sm:$0xff] }
 0x15f   : > { %v532_v3 = vpop.xlane.xlu2 %531 }
 0x160   : > { %v556_v4 = vsub.f32 %v490_v53, %v532_v3  ;;  %v344_v3 = vld [vmem:[%s1697_s13 + $0x28] sm:$0xff] }
 0x161   : > { %v524_v5 = vpop.xlane.xlu0 %523 }
 0x162   : > { %v579_v6 = vmul.f32 1.442695, %v556_v4  ;;  %v552_v7 = vsub.f32 %v478_v54, %v524_v5  ;;  %v343_v4 = vld [vmem:[%s1697_s13 + $0x20] sm:$0xff]  ;;  %v342_v5 = vld [vmem:[%s1697_s13 + $0x18] sm:$0xff] }
 0x164   : > { %v1678_v8 = vpop.eup %1314  ;;  %1316 = vpow2.f32 %v579_v6  ;;  %v571_v9 = vmul.f32 1.442695, %v552_v7  ;;  %v341_v6 = vld [vmem:[%s1697_s13 + $0x10] sm:$0xff]  ;;  %v340_v7 = vld [vmem:[%s1697_s13 + $0x8] sm:$0xff] }
 0x165   : > { %601 = vadd.xlane.f32.xlu1 %v1678_v8 }
 0x166   : > { %1318 = vpow2.f32 %v571_v9  ;;  %v339_v9 = vld [vmem:[%s1697_s13] sm:$0xff] }
 0x169   : > { %v534_v10 = vpop.xlane.xlu0 %533  ;;  %v526_v11 = vpop.xlane.xlu1 %525 }
 0x16a   : > { %v1681_v12 = vpop.eup %1316  ;;  %v553_v13 = vsub.f32 %v481_v57, %v526_v11  ;;  %v557_v31 = vsub.f32 %v1661_v56, %v534_v10 }
 0x16b   : > { %611 = vadd.xlane.f32.xlu0 %v1681_v12 }
 0x16c   : > { %v1684_v14 = vpop.eup %1318  ;;  %v573_v15 = vmul.f32 1.442695, %v553_v13  ;;  %v581_v39 = vmul.f32 1.442695, %v557_v31 }
 0x16d   : > { %603 = vadd.xlane.f32.xlu1 %v1684_v14 }
 0x16e   : > { %1320 = vpow2.f32 %v573_v15 }
 0x16f   : > { %v536_v16 = vpop.xlane.xlu2 %535 }
 0x170   : > { %v558_v34 = vsub.f32 %v1664_v59, %v536_v16 }
 0x171   : > { %v544_v17 = vpop.xlane.xlu0 %543  ;;  %v528_v18 = vpop.xlane.xlu1 %527 }
 0x172   : > { %v562_v19 = vsub.f32 %v508_v58, %v544_v17  ;;  %v554_v20 = vsub.f32 %v484_v49, %v528_v18  ;;  %v583_v42 = vmul.f32 1.442695, %v558_v34 }
 0x174   : > { %v591_v21 = vmul.f32 1.442695, %v562_v19  ;;  %v575_v22 = vmul.f32 1.442695, %v554_v20  ;;  %v1687_v23 = vpop.eup %1320 }
 0x175   : > { %605 = vadd.xlane.f32.xlu1 %v1687_v23 }
 0x176   : > { %1322 = vpow2.f32 %v591_v21 }
 0x177   : > { %1324 = vpow2.f32 %v575_v22  ;;  %v538_v25 = vpop.xlane.xlu2 %537 }
 0x178   : > { %1326 = vpow2.f32 %v577_v27  ;;  %v559_v45 = vsub.f32 %v1667_v60, %v538_v25 }
 0x179   : > { %v546_v26 = vpop.xlane.xlu0 %545 }
 0x17a   : > { %v563_v47 = vsub.f32 %v1669_v61, %v546_v26  ;;  %v585_v48 = vmul.f32 1.442695, %v559_v45 }
 0x17c   : > { %v1699_v29 = vpop.eup %1322  ;;  %v593_v53 = vmul.f32 1.442695, %v563_v47 }
 0x17d   : > { %v1701_v30 = vpop.eup %1324  ;;  %623 = vadd.xlane.f32.xlu0 %v1699_v29  ;;  %547 = vmax.xlane.f32.xlu1 %v1691_v28 }
 0x17e   : > { %607 = vadd.xlane.f32.xlu2 %v1701_v30  ;;  %v1714_v44 = vpop.eup %1326 }
 0x17f   : > { %v518_v35 = vpop.xlane.xlu2 %517 }
 0x180   : > { %v549_v36 = vsub.f32 %v1650_v46, %v518_v35  ;;  %v349_v46 = vld [vmem:[%s1697_s13 + $0x50] sm:$0xff] }
 0x181   : > { %v540_v38 = vpop.xlane.xlu0 %539  ;;  %1235 = vmatpush.msra.mxu1 %v349_v46  ;;  %1236 = vmatpush.msrb.mxu3 %v349_v46 }
 0x182   : > { %v565_v40 = vmul.f32 1.442695, %v549_v36  ;;  %874 = vmatpush.msrb.mxu0 %v349_v46 }
 0x184   : > { %1328 = vpow2.f32 %v565_v40 }
 0x185   : > { %1330 = vpow2.f32 %v581_v39  ;;  %541 = vmax.xlane.f32.xlu1 %v1659_v55 }
 0x186   : > { %609 = vadd.xlane.f32.xlu2 %v1714_v44  ;;  %1332 = vpow2.f32 %v583_v42 }
 0x187   : > { %1334 = vpow2.f32 %v585_v48 }
 0x189   : > { %v520_v49 = vpop.xlane.xlu0 %519 }
 0x18a   : > { %v1721_v51 = vpop.eup %1328  ;;  %v550_v52 = vsub.f32 %v1654_v50, %v520_v49  ;;  %v560_v50 = vsub.f32 %v1673_v62, %v540_v38  ;;  %v348_v62 = vld [vmem:[%s1697_s13 + $0x48] sm:$0xff] }
 0x18b   : > { %597 = vadd.xlane.f32.xlu0 %v1721_v51  ;;  %v1725_v54 = vpop.eup %1330  ;;  %1237 = vmatpush.msra.mxu1 %v348_v62 }
 0x18c   : > { %v567_v56 = vmul.f32 1.442695, %v550_v52  ;;  %v1727_v57 = vpop.eup %1332  ;;  %v587_v59 = vmul.f32 1.442695, %v560_v50  ;;  %1238 = vmatpush.msrb.mxu3 %v348_v62  ;;  %875 = vmatpush.msrb.mxu0 %v348_v62 }
 0x18d   : > { %613 = vadd.xlane.f32.xlu1 %v1725_v54  ;;  %v1732_v58 = vpop.eup %1334  ;;  %1239 = vmatpush.msra.mxu1 %v347_v0 }
 0x18e   : > { %1336 = vpow2.f32 %v567_v56  ;;  %615 = vadd.xlane.f32.xlu2 %v1727_v57  ;;  %1240 = vmatpush.msrb.mxu3 %v347_v0 }
 0x18f   : > { %1338 = vpow2.f32 %v593_v53  ;;  %876 = vmatpush.msrb.mxu0 %v347_v0  ;;  %1241 = vmatpush.msra.mxu1 %v346_v1 }
 0x190   : > { %1340 = vpow2.f32 %v587_v59  ;;  %1242 = vmatpush.msrb.mxu3 %v346_v1 }
 0x191   : > { %877 = vmatpush.msrb.mxu0 %v346_v1  ;;  %1243 = vmatpush.msra.mxu1 %v345_v2 }
 0x192   : > { %1244 = vmatpush.msrb.mxu3 %v345_v2 }
 0x193   : > { %878 = vmatpush.msrb.mxu0 %v345_v2  ;;  %1245 = vmatpush.msra.mxu1 %v344_v3 }
 0x194   : > { %v1734_v60 = vpop.eup %1336  ;;  %1246 = vmatpush.msrb.mxu3 %v344_v3 }
 0x195   : > { %v1736_v61 = vpop.eup %1338  ;;  %599 = vadd.xlane.f32.xlu0 %v1734_v60  ;;  %617 = vadd.xlane.f32.xlu1 %v1732_v58 }
 0x196   : > { %625 = vadd.xlane.f32.xlu2 %v1736_v61  ;;  %v1741_v63 = vpop.eup %1340  ;;  %879 = vmatpush.msrb.mxu0 %v344_v3 }
 0x197   : > { %1247 = vmatpush.msra.mxu1 %v343_v4  ;;  %1248 = vmatpush.msrb.mxu3 %v343_v4 }
 0x198   : > { %880 = vmatpush.msrb.mxu0 %v343_v4 }
 0x199   : > { %1249 = vmatpush.msra.mxu1 %v342_v5  ;;  %1250 = vmatpush.msrb.mxu3 %v342_v5 }
 0x19a   : > { %881 = vmatpush.msrb.mxu0 %v342_v5 }
 0x19b   : > { %1251 = vmatpush.msra.mxu1 %v341_v6  ;;  %1252 = vmatpush.msrb.mxu3 %v341_v6 }
 0x19c   : > { %882 = vmatpush.msrb.mxu0 %v341_v6 }
 0x19d   : > { %619 = vadd.xlane.f32.xlu1 %v1741_v63  ;;  %1253 = vmatpush.msra.mxu1 %v340_v7 }
 0x19e   : > { %1254 = vmatpush.msrb.mxu3 %v340_v7  ;;  %883 = vmatpush.msrb.mxu0 %v340_v7 }
 0x19f   : > { %1255 = vmatpush.msra.mxu1 %v339_v9 }
 0x1a0   : > { %1256 = vmatpush.msrb.mxu3 %v339_v9  ;;  %884 = vmatpush.msrb.mxu0 %v339_v9 }
 0x1d8   : > { %v602_v10 = vpop.xlane.xlu1 %601 }
 0x1d9   : > { %1342 = vrcp.f32 %v602_v10  ;;  %v670_v18 = vand.u32 2147483648, %v602_v10  ;;  %v668_v20 = vand.u32 2147483647, %v602_v10  ;;  %vm664_vm2 = vweird.f32 %v602_v10 }
 0x1db   : > { %v671_v26 = vor.u32 1.1754944e-38, %v670_v18  ;;  %vm669_vm4 = vcmp.eq.f32.partialorder %v668_v20, 8.507059e+37 }
 0x1de   : > { %v612_v11 = vpop.xlane.xlu0 %611 }
 0x1df   : > { %v1343_v13 = vpop.eup %1342  ;;  %1344 = vrcp.f32 %v612_v11  ;;  %v743_v35 = vand.u32 2147483647, %v612_v11  ;;  %v745_v36 = vand.u32 2147483648, %v612_v11  ;;  %vm739_vm6 = vweird.f32 %v612_v11 }
 0x1e0   : > { %v660_v15 = vmul.f32 %v1343_v13, %v602_v10  ;;  %v604_v16 = vpop.xlane.xlu1 %603  ;;  %vm665_vm1 = vweird.f32 %v1343_v13 }
 0x1e1   : > { %1346 = vrcp.f32 %v604_v16  ;;  %vm666_vm3 = vmor %vm664_vm2, %vm665_vm1  ;;  %v685_v41 = vand.u32 2147483648, %v604_v16  ;;  %v683_v43 = vand.u32 2147483647, %v604_v16  ;;  %v746_v45 = vor.u32 1.1754944e-38, %v745_v36 }
 0x1e2   : > { %v661_v17 = vsub.f32 1.0, %v660_v15  ;;  %vm679_vm9 = vweird.f32 %v604_v16  ;;  %vm744_vm10 = vcmp.eq.f32.partialorder %v743_v35, 8.507059e+37 }
 0x1e3   : > { %v686_v53 = vor.u32 1.1754944e-38, %v685_v41  ;;  %vm684_vm12 = vcmp.eq.f32.partialorder %v683_v43, 8.507059e+37 }
 0x1e4   : > { %v662_v19 = vmul.f32 %v1343_v13, %v661_v17 }
 0x1e5   : > { %v1345_v21 = vpop.eup %1344 }
 0x1e6   : > { %v735_v22 = vmul.f32 %v1345_v21, %v612_v11  ;;  %v663_v24 = vadd.f32 %v1343_v13, %v662_v19  ;;  %vm740_vm5 = vweird.f32 %v1345_v21 }
 0x1e7   : > { %v1347_v25 = vpop.eup %1346  ;;  %vm741_vm8 = vmor %vm739_vm6, %vm740_vm5 }
 0x1e8   : > { %v736_v27 = vsub.f32 1.0, %v735_v22  ;;  %v675_v31 = vmul.f32 %v1347_v25, %v604_v16  ;;  %v667_v32 = vsel %vm666_vm3, %v1343_v13, %v663_v24  ;;  %v1757_v33 = vpop.xlane.xlu1 %605  ;;  %vm680_vm7 = vweird.f32 %v1347_v25 }
 0x1e9   : > { %v672_v34 = vsel %vm669_vm4, %v671_v26, %v667_v32  ;;  %1348 = vrcp.f32 %v1757_v33  ;;  %vm681_vm11 = vmor %vm679_vm9, %vm680_vm7  ;;  %v698_v6 = vand.u32 2147483647, %v1757_v33  ;;  %vm694_vm14 = vweird.f32 %v1757_v33 }
 0x1ea   : > { %v737_v37 = vmul.f32 %v1345_v21, %v736_v27  ;;  %v676_v38 = vsub.f32 1.0, %v675_v31  ;;  %v673_v39 = vmul.f32 %v1678_v8, %v672_v34 }
 0x1eb   : > { %vm699_vm1 = vcmp.eq.f32.partialorder %v698_v6, 8.507059e+37 }
 0x1ec   : > { %v677_v40 = vmul.f32 %v1347_v25, %v676_v38  ;;  %891 = vmatmul.f32.vlgmr.msra.gmra.mxu1 %v673_v39  ;;  %952 = vst [vmem:[%s1761_s22 + $0x10] sm:$0xff] %v673_v39  ;;  %v738_v42 = vadd.f32 %v1345_v21, %v737_v37 }
 0x1ee   : > { %v678_v46 = vadd.f32 %v1347_v25, %v677_v40  ;;  %v742_v47 = vsel %vm741_vm8, %v1345_v21, %v738_v42 }
 0x1ef   : > { %v747_v8 = vsel %vm744_vm10, %v746_v45, %v742_v47  ;;  %v1349_v48 = vpop.eup %1348 }
 0x1f0   : > { %v1765_v49 = vpop.xlane.xlu0 %623  ;;  %v682_v52 = vsel %vm681_vm11, %v1347_v25, %v678_v46  ;;  %v1768_v56 = vmul.f32 %v1681_v12, %v747_v8  ;;  %v690_v50 = vmul.f32 %v1349_v48, %v1757_v33  ;;  %v548_v62 = vpop.xlane.xlu1 %547  ;;  %v700_v12 = vand.u32 2147483648, %v1757_v33 }
 0x1f1   : > { %1350 = vrcp.f32 %v1765_v49  ;;  %v608_v59 = vpop.xlane.xlu2 %607  ;;  %v564_v0 = vsub.f32 %v1691_v28, %v548_v62  ;;  %v687_v1 = vsel %vm684_vm12, %v686_v53, %v682_v52  ;;  %vm695_vm13 = vweird.f32 %v1349_v48 }
 0x1f2   : > { %1352 = vrcp.f32 %v608_v59  ;;  %957 = vst [vmem:[%s1761_s22 + $0x38] sm:$0xff] %v1768_v56  ;;  %v691_v2 = vsub.f32 1.0, %v690_v50  ;;  %v688_v3 = vmul.f32 %v1684_v14, %v687_v1  ;;  %vm696_vm15 = vmor %vm694_vm14, %vm695_vm13  ;;  %v701_v11 = vor.u32 1.1754944e-38, %v700_v12 }
 0x1f3   : > { %v595_v4 = vmul.f32 1.442695, %v564_v0  ;;  %v835_v14 = vand.u32 2147483648, %v1765_v49  ;;  %v713_v24 = vand.u32 2147483647, %v608_v59  ;;  %v715_v25 = vand.u32 2147483648, %v608_v59 }
 0x1f4   : > { %v692_v5 = vmul.f32 %v1349_v48, %v691_v2  ;;  %894 = vmatmul.f32.gmra.mxu1 %v688_v3  ;;  %953 = vst [vmem:[%s1761_s22 + $0x18] sm:$0xff] %v688_v3  ;;  %v833_v32 = vand.u32 2147483647, %v1765_v49  ;;  %vm829_vm4 = vweird.f32 %v1765_v49  ;;  %vm709_vm5 = vweird.f32 %v608_v59 }
 0x1f5   : > { %1354 = vpow2.f32 %v595_v4  ;;  %vm1796_vm6 = vcmp.eq.f32.partialorder %v713_v24, 8.507059e+37  ;;  %v716_v38 = vor.u32 1.1754944e-38, %v715_v25 }
 0x1f6   : > { %v693_v9 = vadd.f32 %v1349_v48, %v692_v5  ;;  %vm834_vm9 = vcmp.eq.f32.partialorder %v833_v32, 8.507059e+37 }
 0x1f7   : > { %v1351_v7 = vpop.eup %1350 }
 0x1f8   : > { %v1353_v28 = vpop.eup %1352  ;;  %v825_v10 = vmul.f32 %v1351_v7, %v1765_v49  ;;  %v542_v16 = vpop.xlane.xlu1 %541  ;;  %v697_v17 = vsel %vm696_vm15, %v1349_v48, %v693_v9  ;;  %vm830_vm2 = vweird.f32 %v1351_v7 }
 0x1f9   : > { %v705_v13 = vmul.f32 %v1353_v28, %v608_v59  ;;  %v1782_v15 = vpop.xlane.xlu2 %609  ;;  %v561_v19 = vsub.f32 %v1659_v55, %v542_v16  ;;  %v702_v20 = vsel %vm699_vm1, %v701_v11, %v697_v17  ;;  %vm710_vm3 = vweird.f32 %v1353_v28  ;;  %vm831_vm7 = vmor %vm829_vm4, %vm830_vm2 }
 0x1fa   : > { %v826_v18 = vsub.f32 1.0, %v825_v10  ;;  %1356 = vrcp.f32 %v1782_v15  ;;  %v703_v22 = vmul.f32 %v1687_v23, %v702_v20  ;;  %v836_v55 = vor.u32 1.1754944e-38, %v835_v14  ;;  %vm711_vm8 = vmor %vm709_vm5, %vm710_vm3 }
 0x1fb   : > { %v706_v21 = vsub.f32 1.0, %v705_v13  ;;  %v1787_v26 = vpop.eup %1354  ;;  %v589_v31 = vmul.f32 1.442695, %v561_v19  ;;  %v728_v40 = vand.u32 2147483647, %v1782_v15  ;;  %v730_v47 = vand.u32 2147483648, %v1782_v15 }
 0x1fc   : > { %v827_v27 = vmul.f32 %v1351_v7, %v826_v18  ;;  %897 = vmatmul.f32.gmra.mxu1 %v703_v22  ;;  %954 = vst [vmem:[%s1761_s22 + $0x20] sm:$0xff] %v703_v22  ;;  %627 = vadd.xlane.f32.xlu2 %v1787_v26  ;;  %vm724_vm10 = vweird.f32 %v1782_v15 }
 0x1fd   : > { %v707_v33 = vmul.f32 %v1353_v28, %v706_v21  ;;  %1358 = vpow2.f32 %v589_v31  ;;  %vm1823_vm12 = vcmp.eq.f32.partialorder %v728_v40, 8.507059e+37 }
 0x1fe   : > { %v1793_v23 = vpop.xlane.xlu0 %597  ;;  %v828_v34 = vadd.f32 %v1351_v7, %v827_v27 }
 0x1ff   : > { %1360 = vrcp.f32 %v1793_v23  ;;  %v708_v35 = vadd.f32 %v1353_v28, %v707_v33  ;;  %v640_v8 = vand.u32 2147483648, %v1793_v23  ;;  %v638_v50 = vand.u32 2147483647, %v1793_v23 }
 0x200   : > { %v1357_v37 = vpop.eup %1356  ;;  %v832_v39 = vsel %vm831_vm7, %v1351_v7, %v828_v34  ;;  %v1805_v43 = vpop.xlane.xlu1 %613  ;;  %vm634_vm13 = vweird.f32 %v1793_v23 }
 0x201   : > { %v720_v41 = vmul.f32 %v1357_v37, %v1782_v15  ;;  %v1803_v42 = vpop.xlane.xlu2 %615  ;;  %v712_v45 = vsel %vm711_vm8, %v1353_v28, %v708_v35  ;;  %v837_v46 = vsel %vm834_vm9, %v836_v55, %v832_v39  ;;  %vm725_vm11 = vweird.f32 %v1357_v37 }
 0x202   : > { %1362 = vrcp.f32 %v1803_v42  ;;  %v717_v48 = vsel %vm1796_vm6, %v716_v38, %v712_v45  ;;  %v838_v49 = vmul.f32 %v1699_v29, %v837_v46  ;;  %v641_v2 = vor.u32 1.1754944e-38, %v640_v8  ;;  %vm726_vm1 = vmor %vm724_vm10, %vm725_vm11 }
 0x203   : > { %v721_v52 = vsub.f32 1.0, %v720_v41  ;;  %1364 = vrcp.f32 %v1805_v43  ;;  %v718_v53 = vmul.f32 %v1701_v30, %v717_v48  ;;  %v1816_v59 = vpop.eup %1358  ;;  %v731_v30 = vor.u32 1.1754944e-38, %v730_v47 }
 0x204   : > { %924 = vmatmul.f32.vlgmr.msrb.gmra.mxu3 %v838_v49  ;;  %963 = vst [vmem:[%s1761_s22 + $0x68] sm:$0xff] %v838_v49  ;;  %621 = vadd.xlane.f32.xlu1 %v1816_v59  ;;  %vm1828_vm14 = vcmp.eq.f32.partialorder %v638_v50, 8.507059e+37  ;;  %vm754_vm15 = vweird.f32 %v1805_v43  ;;  %v758_v7 = vand.u32 2147483647, %v1805_v43  ;;  %v760_v9 = vand.u32 2147483648, %v1805_v43 }
 0x205   : > { %v1361_v62 = vpop.eup %1360  ;;  %v722_v0 = vmul.f32 %v1357_v37, %v721_v52  ;;  %900 = vmatmul.f32.gmra.mxu1 %v718_v53  ;;  %955 = vst [vmem:[%s1761_s22 + $0x28] sm:$0xff] %v718_v53  ;;  %v773_v28 = vand.u32 2147483647, %v1803_v42  ;;  %v775_v16 = vand.u32 2147483648, %v1803_v42  ;;  %vm769_vm3 = vweird.f32 %v1803_v42 }
 0x206   : > { %v630_v29 = vmul.f32 %v1361_v62, %v1793_v23  ;;  %vm635_vm2 = vweird.f32 %v1361_v62  ;;  %vm1858_vm4 = vcmp.eq.f32.partialorder %v758_v7, 8.507059e+37  ;;  %v761_v31 = vor.u32 1.1754944e-38, %v760_v9 }
 0x207   : > { %v723_v3 = vadd.f32 %v1357_v37, %v722_v0  ;;  %vm636_vm5 = vmor %vm634_vm13, %vm635_vm2  ;;  %vm1866_vm6 = vcmp.eq.f32.partialorder %v773_v28, 8.507059e+37  ;;  %v776_v33 = vor.u32 1.1754944e-38, %v775_v16 }
 0x208   : > { %v1832_v12 = vpop.eup %1362  ;;  %v631_v5 = vsub.f32 1.0, %v630_v29  ;;  %v1834_v6 = vpop.xlane.xlu0 %599 }
 0x209   : > { %v1365_v10 = vpop.eup %1364  ;;  %v765_v11 = vmul.f32 %v1832_v12, %v1803_v42  ;;  %1366 = vrcp.f32 %v1834_v6  ;;  %v1843_v14 = vpop.xlane.xlu2 %625  ;;  %v727_v19 = vsel %vm726_vm1, %v1357_v37, %v723_v3  ;;  %vm649_vm7 = vweird.f32 %v1834_v6 }
 0x20a   : > { %v1845_v13 = vpop.xlane.xlu1 %617  ;;  %v632_v17 = vmul.f32 %v1361_v62, %v631_v5  ;;  %v750_v18 = vmul.f32 %v1365_v10, %v1805_v43  ;;  %1368 = vrcp.f32 %v1843_v14  ;;  %v732_v21 = vsel %vm1823_vm12, %v731_v30, %v727_v19 }
 0x20b   : > { %v766_v20 = vsub.f32 1.0, %v765_v11  ;;  %1370 = vrcp.f32 %v1845_v13  ;;  %v733_v22 = vmul.f32 %v1714_v44, %v732_v21  ;;  %vm755_vm8 = vweird.f32 %v1365_v10 }
 0x20c   : > { %v751_v15 = vsub.f32 1.0, %v750_v18  ;;  %v633_v24 = vadd.f32 %v1361_v62, %v632_v17  ;;  %v655_v35 = vand.u32 2147483648, %v1834_v6  ;;  %vm770_vm9 = vweird.f32 %v1832_v12  ;;  %vm756_vm11 = vmor %vm754_vm15, %vm755_vm8 }
 0x20d   : > { %v767_v27 = vmul.f32 %v1832_v12, %v766_v20  ;;  %903 = vmatmul.f32.gmra.mxu1 %v733_v22  ;;  %956 = vst [vmem:[%s1761_s22 + $0x30] sm:$0xff] %v733_v22  ;;  %v653_v40 = vand.u32 2147483647, %v1834_v6  ;;  %vm1882_vm10 = vmor %vm769_vm3, %vm770_vm9  ;;  %v850_v48 = vand.u32 2147483648, %v1843_v14  ;;  %v790_v4 = vand.u32 2147483648, %v1845_v13 }
 0x20e   : > { %v752_v55 = vmul.f32 %v1365_v10, %v751_v15  ;;  %v637_v44 = vsel %vm636_vm5, %v1361_v62, %v633_v24  ;;  %v788_v7 = vand.u32 2147483647, %v1845_v13  ;;  %vm844_vm2 = vweird.f32 %v1843_v14 }
 0x20f   : > { %v1367_v34 = vpop.eup %1366  ;;  %v642_v23 = vsel %vm1828_vm14, %v641_v2, %v637_v44  ;;  %v768_v36 = vadd.f32 %v1832_v12, %v767_v27  ;;  %v656_v2 = vor.u32 1.1754944e-38, %v655_v35  ;;  %vm654_vm1 = vcmp.eq.f32.partialorder %v653_v40, 8.507059e+37 }
 0x210   : > { %v1369_v37 = vpop.eup %1368  ;;  %v645_v38 = vmul.f32 %v1367_v34, %v1834_v6  ;;  %v643_v39 = vmul.f32 %v1721_v51, %v642_v23  ;;  %v753_v41 = vadd.f32 %v1365_v10, %v752_v55  ;;  %v848_v51 = vand.u32 2147483647, %v1843_v14 }
 0x211   : > { %v1371_v46 = vpop.eup %1370  ;;  %v840_v47 = vmul.f32 %v1369_v37, %v1843_v14  ;;  %v772_v42 = vsel %vm1882_vm10, %v1832_v12, %v768_v36  ;;  %vm650_vm12 = vweird.f32 %v1367_v34  ;;  %vm845_vm13 = vweird.f32 %v1369_v37 }
 0x212   : > { %v1887_v8 = vpop.xlane.xlu1 %619  ;;  %v646_v49 = vsub.f32 1.0, %v645_v38  ;;  %v780_v52 = vmul.f32 %v1371_v46, %v1845_v13  ;;  %885 = vmatmul.f32.vlgmr.msrb.gmra.mxu0 %v643_v39  ;;  %950 = vst [vmem:[%s1761_s22] sm:$0xff] %v643_v39  ;;  %v757_v53 = vsel %vm756_vm11, %v1365_v10, %v753_v41  ;;  %v777_v62 = vsel %vm1866_vm6, %v776_v33, %v772_v42  ;;  %vm651_vm15 = vmor %vm649_vm7, %vm650_vm12 }
 0x213   : > { %1372 = vrcp.f32 %v1887_v8  ;;  %v841_v43 = vsub.f32 1.0, %v840_v47  ;;  %v762_v50 = vsel %vm1858_vm4, %v761_v31, %v757_v53  ;;  %v778_v30 = vmul.f32 %v1727_v57, %v777_v62  ;;  %vm846_vm4 = vmor %vm844_vm2, %vm845_vm13 }
 0x214   : > { %v647_v0 = vmul.f32 %v1367_v34, %v646_v49  ;;  %v781_v29 = vsub.f32 1.0, %v780_v52  ;;  %v763_v1 = vmul.f32 %v1725_v54, %v762_v50  ;;  %vm785_vm14 = vweird.f32 %v1371_v46 }
 0x215   : > { %v842_v3 = vmul.f32 %v1369_v37, %v841_v43  ;;  %906 = vmatmul.f32.gmra.mxu1 %v1768_v56  ;;  %vm849_vm3 = vcmp.eq.f32.partialorder %v848_v51, 8.507059e+37  ;;  %959 = vst [vmem:[%s1761_s22 + $0x48] sm:$0xff] %v778_v30  ;;  %v851_v56 = vor.u32 1.1754944e-38, %v850_v48  ;;  %vm784_vm5 = vweird.f32 %v1845_v13 }
 0x216   : > { %v782_v12 = vmul.f32 %v1371_v46, %v781_v29  ;;  %v648_v5 = vadd.f32 %v1367_v34, %v647_v0  ;;  %958 = vst [vmem:[%s1761_s22 + $0x40] sm:$0xff] %v763_v1  ;;  %vm786_vm6 = vmor %vm784_vm5, %vm785_vm14  ;;  %v791_v16 = vor.u32 1.1754944e-38, %v790_v4  ;;  %vm789_vm7 = vcmp.eq.f32.partialorder %v788_v7, 8.507059e+37 }
 0x217   : > { %v843_v54 = vadd.f32 %v1369_v37, %v842_v3  ;;  %v805_v15 = vand.u32 2147483648, %v1887_v8  ;;  %vm799_vm9 = vweird.f32 %v1887_v8 }
 0x218   : > { %v652_v9 = vsel %vm651_vm15, %v1367_v34, %v648_v5  ;;  %v783_v28 = vadd.f32 %v1371_v46, %v782_v12 }
 0x219   : > { %v1373_v57 = vpop.eup %1372  ;;  %v657_v11 = vsel %vm654_vm1, %v656_v2, %v652_v9  ;;  %v847_v6 = vsel %vm846_vm4, %v1369_v37, %v843_v54 }
 0x21a   : > { %v795_v10 = vmul.f32 %v1373_v57, %v1887_v8  ;;  %v658_v14 = vmul.f32 %v1734_v60, %v657_v11  ;;  %v852_v17 = vsel %vm849_vm3, %v851_v56, %v847_v6  ;;  %v787_v18 = vsel %vm786_vm6, %v1371_v46, %v783_v28 }
 0x21b   : > { %v853_v20 = vmul.f32 %v1736_v61, %v852_v17  ;;  %v792_v21 = vsel %vm789_vm7, %v791_v16, %v787_v18  ;;  %vm800_vm8 = vweird.f32 %v1373_v57  ;;  %v803_v60 = vand.u32 2147483647, %v1887_v8 }
 0x21c   : > { %v796_v19 = vsub.f32 1.0, %v795_v10  ;;  %888 = vmatmul.f32.gmra.mxu0 %v658_v14  ;;  %951 = vst [vmem:[%s1761_s22 + $0x8] sm:$0xff] %v658_v14  ;;  %v793_v13 = vmul.f32 %v1732_v58, %v792_v21  ;;  %vm801_vm10 = vmor %vm799_vm9, %vm800_vm8  ;;  %v806_v61 = vor.u32 1.1754944e-38, %v805_v15 }
 0x21d   : > { %927 = vmatmul.f32.gmra.mxu3 %v853_v20  ;;  %964 = vst [vmem:[%s1761_s22 + $0x70] sm:$0xff] %v853_v20  ;;  %909 = vmatmul.f32.gmra.mxu1 %v763_v1  ;;  %vm804_vm11 = vcmp.eq.f32.partialorder %v803_v60, 8.507059e+37 }
 0x21e   : > { %v797_v22 = vmul.f32 %v1373_v57, %v796_v19  ;;  %960 = vst [vmem:[%s1761_s22 + $0x50] sm:$0xff] %v793_v13 }
 0x220   : > { %v798_v24 = vadd.f32 %v1373_v57, %v797_v22 }
 0x222   : > { %v802_v25 = vsel %vm801_vm10, %v1373_v57, %v798_v24 }
 0x223   : > { %v807_v58 = vsel %vm804_vm11, %v806_v61, %v802_v25 }
 0x224   : > { %v808_v27 = vmul.f32 %v1741_v63, %v807_v58 }
 0x225   : > { %912 = vmatmul.f32.gmra.mxu1 %v778_v30 }
 0x226   : > { %961 = vst [vmem:[%s1761_s22 + $0x58] sm:$0xff] %v808_v27 }
 0x22d   : > { %915 = vmatmul.f32.gmra.mxu1 %v793_v13 }
 0x235   : > { %918 = vmatmul.f32.gmra.mxu1 %v808_v27 }
 0x269   : > { %v892_v31 = vpop.f32.mrf.mxu1 }
 0x26a   : > { %936 = vst.msk [vmem:[%s1934_s29 + $0x10] sm:$0xff] %vm355_vm0, %v892_v31 }
 0x26f   : > { %v628_v32 = vpop.xlane.xlu2 %627 }
 0x270   : > { %1374 = vrcp.f32 %v628_v32  ;;  %v865_v23 = vand.u32 2147483648, %v628_v32  ;;  %v863_v37 = vand.u32 2147483647, %v628_v32  ;;  %vm859_vm13 = vweird.f32 %v628_v32 }
 0x271   : > { %v895_v33 = vpop.f32.mrf.mxu1 }
 0x272   : > { %937 = vst.msk [vmem:[%s1934_s29 + $0x18] sm:$0xff] %vm355_vm0, %v895_v33  ;;  %v866_v40 = vor.u32 1.1754944e-38, %v865_v23  ;;  %vm864_vm15 = vcmp.eq.f32.partialorder %v863_v37, 8.507059e+37 }
 0x276   : > { %v1375_v63 = vpop.eup %1374 }
 0x277   : > { %v855_v55 = vmul.f32 %v1375_v63, %v628_v32  ;;  %v622_v44 = vpop.xlane.xlu1 %621  ;;  %vm860_vm12 = vweird.f32 %v1375_v63 }
 0x278   : > { %1376 = vrcp.f32 %v622_v44  ;;  %vm861_vm14 = vmor %vm859_vm13, %vm860_vm12  ;;  %v820_v48 = vand.u32 2147483648, %v622_v44  ;;  %v818_v49 = vand.u32 2147483647, %v622_v44  ;;  %vm814_vm2 = vweird.f32 %v622_v44 }
 0x279   : > { %v856_v34 = vsub.f32 1.0, %v855_v55  ;;  %v898_v35 = vpop.f32.mrf.mxu1 }
 0x27a   : > { %938 = vst.msk [vmem:[%s1934_s29 + $0x20] sm:$0xff] %vm355_vm0, %v898_v35  ;;  %v821_v53 = vor.u32 1.1754944e-38, %v820_v48  ;;  %vm819_vm4 = vcmp.eq.f32.partialorder %v818_v49, 8.507059e+37 }
 0x27b   : > { %v857_v36 = vmul.f32 %v1375_v63, %v856_v34 }
 0x27d   : > { %v858_v38 = vadd.f32 %v1375_v63, %v857_v36 }
 0x27e   : > { %v1377_v39 = vpop.eup %1376 }
 0x27f   : > { %v810_v41 = vmul.f32 %v1377_v39, %v622_v44  ;;  %v862_v45 = vsel %vm861_vm14, %v1375_v63, %v858_v38  ;;  %vm815_vm1 = vweird.f32 %v1377_v39 }
 0x280   : > { %v867_v46 = vsel %vm864_vm15, %v866_v40, %v862_v45  ;;  %vm816_vm3 = vmor %vm814_vm2, %vm815_vm1 }
 0x281   : > { %v811_v47 = vsub.f32 1.0, %v810_v41  ;;  %v868_v51 = vmul.f32 %v1787_v26, %v867_v46 }
 0x282   : > { %v901_v8 = vpop.f32.mrf.mxu1 }
 0x283   : > { %939 = vst.msk [vmem:[%s1934_s29 + $0x28] sm:$0xff] %vm355_vm0, %v901_v8  ;;  %v812_v42 = vmul.f32 %v1377_v39, %v811_v47  ;;  %930 = vmatmul.f32.gmra.mxu3 %v868_v51 }
 0x284   : > { %965 = vst [vmem:[%s1761_s22 + $0x78] sm:$0xff] %v868_v51 }
 0x285   : > { %v813_v52 = vadd.f32 %v1377_v39, %v812_v42 }
 0x287   : > { %v925_v43 = vpop.f32.mrf.mxu3  ;;  %v817_v26 = vsel %vm816_vm3, %v1377_v39, %v813_v52 }
 0x288   : > { %947 = vst.msk [vmem:[%s1934_s29 + $0x68] sm:$0xff] %vm355_vm0, %v925_v43  ;;  %v822_v50 = vsel %vm819_vm4, %v821_v53, %v817_v26 }
 0x289   : > { %v823_v62 = vmul.f32 %v1816_v59, %v822_v50 }
 0x28a   : > { %v904_v0 = vpop.f32.mrf.mxu1 }
 0x28b   : > { %940 = vst.msk [vmem:[%s1934_s29 + $0x30] sm:$0xff] %vm355_vm0, %v904_v0  ;;  %921 = vmatmul.f32.gmra.mxu1 %v823_v62 }
 0x28c   : > { %962 = vst [vmem:[%s1761_s22 + $0x60] sm:$0xff] %v823_v62 }
 0x28d   : > { %1405 = shalt.err (!%p1402_p5)
}
 0x28e   : > { %s1458_s14 = smov 128   ;;  %s1459_s22 = smov 8  }
 0x28f   : > { %1257 = dma.vmem_to_hbm [thread:$0]  (%p1525_p4), %s995_s5, 2048, %s997_s9, %s976_s10, %s1458_s14, %s1458_s14, %s1459_s22   ;;  %v886_v59 = vpop.f32.mrf.mxu0 }
 0x290   : > { %934 = vst.msk [vmem:[%s1934_s29] sm:$0xff] %vm355_vm0, %v886_v59 }
 0x292   : > { %v907_v29 = vpop.f32.mrf.mxu1 }
 0x293   : > { %941 = vst.msk [vmem:[%s1934_s29 + $0x38] sm:$0xff] %vm355_vm0, %v907_v29 }
 0x299   : > { %v889_v1 = vpop.f32.mrf.mxu0 }
 0x29a   : > { %935 = vst.msk [vmem:[%s1934_s29 + $0x8] sm:$0xff] %vm355_vm0, %v889_v1  ;;  %v910_v30 = vpop.f32.mrf.mxu1 }
 0x29b   : > { %942 = vst.msk [vmem:[%s1934_s29 + $0x40] sm:$0xff] %vm355_vm0, %v910_v30 }
 0x2a0   : > { %v928_v2 = vpop.f32.mrf.mxu3 }
 0x2a1   : > { %948 = vst.msk [vmem:[%s1934_s29 + $0x70] sm:$0xff] %vm355_vm0, %v928_v2 }
 0x2a2   : > { %v913_v3 = vpop.f32.mrf.mxu1 }
 0x2a3   : > { %943 = vst.msk [vmem:[%s1934_s29 + $0x48] sm:$0xff] %vm355_vm0, %v913_v3 }
 0x2aa   : > { %v916_v4 = vpop.f32.mrf.mxu1 }
 0x2ab   : > { %944 = vst.msk [vmem:[%s1934_s29 + $0x50] sm:$0xff] %vm355_vm0, %v916_v4 }
 0x2b2   : > { %v919_v12 = vpop.f32.mrf.mxu1 }
 0x2b3   : > { %945 = vst.msk [vmem:[%s1934_s29 + $0x58] sm:$0xff] %vm355_vm0, %v919_v12 }
 0x306   : > { %v931_v5 = vpop.f32.mrf.mxu3 }
 0x307   : > { %949 = vst.msk [vmem:[%s1934_s29 + $0x78] sm:$0xff] %vm355_vm0, %v931_v5 }
 0x308   : > { %v922_v7 = vpop.f32.mrf.mxu1 }
 0x309   : > { %946 = vst.msk [vmem:[%s1934_s29 + $0x60] sm:$0xff] %vm355_vm0, %v922_v7 }
 0x30a PF: > { %p1263_p4 = scmp.ge.s32.totalorder %s1456_s20, 2  ;;  %s1023_s25 = sand.u32 1, %s1436_s15  }
 0x30b   : > { %s1024_s30 = scalar_lea.sflag [#allocation3], %s1023_s25 }
 0x30c   : > { %p1260_p6 = pnand %p1263_p4, %p1532_p8 }
 0x30e   : > { %p1261_p7 = pneg %p1260_p6 }
 0x310   : > { %1431 = dma.done.wait (%p1261_p7), %s1024_s30, 2048  }
 0x311   : > { %1433 = vsyncadd (%p1261_p7), %s1024_s30, 4294965248  ;;  %s18_s20 = sadd.s32 1, %s1456_s20   ;;  %s2030_s15 = smov %s1440_s16 }
 0x312   : > { %p15_p9 = scmp.ge.s32.totalorder %s18_s20, 10   ;;  %s2031_s16 = smov %s1444_s17 }
 0x313   : > { %s2032_s17 = smov %s1538_s28  ;;  %s2033_s18 = smov %s1452_s19 }
 0x314   : > { %s2034_s19 = smov %s2036_s23  ;;  %17 = sbr.rel (!%p15_p9) target bundleno = 4 (0x4), region = 85 }
 0x319   :  { %1030 = vsyncpa [#allocation3], 1 }
 0x31a   :  { %1032 = vsyncpa [#allocation3 + $0x1], 1 }

</bundles_post_ra>
